<compile_context>
chip_gen: v7x
topology: tpu7x:2x2x1
jax: 0.10.0
libtpu: 0.0.40
codegen_flags: <defaults>
</compile_context>

<pallas_src>
import functools
import math

import jax
import jax.numpy as jnp
from jax import lax
from jax.experimental import pallas as pl
from jax.experimental.pallas import tpu as pltpu


# ----------------------------------------------------------------------------
# helpers
# ----------------------------------------------------------------------------
def _pick_tile(dim, candidates):
    """Largest candidate tile that divides `dim`, else the full dim."""
    for c in candidates:
        if dim >= c and dim % c == 0:
            return c
    return dim


def _vmem_limit(per_step_bytes):
    # Keep <= 56 MiB so we stay inside v7x's 64 MiB physical VMEM with headroom
    # for compiler scratch; v5e/v6e (128 MiB) are unaffected.
    return int(min(56 * 1024 * 1024, max(32 * 1024 * 1024, 2 * per_step_bytes)))


# ----------------------------------------------------------------------------
# tiled linear: (M, K) @ (K, N) -> (M, N), bf16 operands, f32 accumulation
# ----------------------------------------------------------------------------
def _matmul_kernel(x_ref, w_ref, o_ref, acc_ref):
    @pl.when(pl.program_id(2) == 0)
    def _():
        acc_ref[...] = jnp.zeros_like(acc_ref)

    acc_ref[...] += jnp.dot(x_ref[...], w_ref[...],
                            preferred_element_type=jnp.float32)

    @pl.when(pl.program_id(2) == pl.num_programs(2) - 1)
    def _():
        o_ref[...] = acc_ref[...].astype(o_ref.dtype)


def linear_pallas(x, w_t, out_dtype=jnp.float32):
    """x: (M, K) @ w_t: (K, N) -> (M, N) with a K-reduction grid axis."""
    M, K = x.shape
    N = w_t.shape[1]
    tm = _pick_tile(M, (256, 128, 64, 32, 16, 8))
    tn = _pick_tile(N, (512, 256, 128))
    tk = _pick_tile(K, (512, 256, 128))
    x16 = x.astype(jnp.bfloat16)
    w16 = w_t.astype(jnp.bfloat16)
    out_bytes = jnp.dtype(out_dtype).itemsize
    per_step = (2 * tm * tk * 2 + 2 * tk * tn * 2          # double-buffered bf16 in
                + 2 * tm * tn * out_bytes + tm * tn * 4)   # out + f32 acc scratch
    return pl.pallas_call(
        _matmul_kernel,
        out_shape=jax.ShapeDtypeStruct((M, N), out_dtype),
        grid=(M // tm, N // tn, K // tk),
        in_specs=[pl.BlockSpec((tm, tk), lambda i, j, k: (i, k)),
                  pl.BlockSpec((tk, tn), lambda i, j, k: (k, j))],
        out_specs=pl.BlockSpec((tm, tn), lambda i, j, k: (i, j)),
        scratch_shapes=[pltpu.VMEM((tm, tn), jnp.float32)],
        compiler_params=pltpu.CompilerParams(
            dimension_semantics=("parallel", "parallel", "arbitrary"),
            vmem_limit_bytes=_vmem_limit(per_step)),
    )(x16, w16)


# ----------------------------------------------------------------------------
# fused top-k attention kernel
#   grid = (B*kvH, G, num_q_tiles); everything for one step stays in VMEM.
# ----------------------------------------------------------------------------
def _rope_inkernel(x, cos, sin, half):
    # rotate_half(x) = concat(-x2, x1); roll(x, half) = concat(x2, x1) so apply
    # a +/-1 sign vector (VPU) after an XLU roll instead of lane-slicing.
    sign = jnp.where(lax.broadcasted_iota(jnp.int32, x.shape, 1) < half,
                     jnp.float32(-1.0), jnp.float32(1.0))
    rot = pltpu.roll(x, shift=half, axis=1) * sign
    return x * cos + rot * sin


def _topk_attn_kernel(q_ref, ks_ref, vs_ref, pk_ref, pv_ref, cos_ref, sin_ref,
                      o_ref, *, topk, causal, tq, scale):
    qi = pl.program_id(2)
    D = q_ref.shape[-1]
    half = D // 2

    cos_k = cos_ref[...]                                   # (T, D) f32
    sin_k = sin_ref[...]
    cos_q = cos_ref[pl.ds(qi * tq, tq), :]                 # (tq, D)
    sin_q = sin_ref[pl.ds(qi * tq, tq), :]

    # RoPE + 1/sqrt(D) scale + bf16 cast fused into the prologue (no extra HBM
    # round-trips between the QKV projection and this kernel).
    q = _rope_inkernel(q_ref[...].astype(jnp.float32), cos_q, sin_q, half)
    q = (q * scale).astype(jnp.bfloat16)                   # (tq, D)
    ks = _rope_inkernel(ks_ref[...].astype(jnp.float32), cos_k, sin_k,
                        half).astype(jnp.bfloat16)         # (T, D)
    vs = vs_ref[...]                                       # (T, D) bf16
    pk = pk_ref[0]                                         # (Npref, D) bf16
    pv = pv_ref[0]                                         # (Npref, D) bf16

    dn = (((1,), (1,)), ((), ()))  # contract last dims -> no RHS transpose
    sp = lax.dot_general(q, pk, dn, preferred_element_type=jnp.float32)  # (tq,Npref)
    sd = lax.dot_general(q, ks, dn, preferred_element_type=jnp.float32)  # (tq,T)

    if causal:
        row = qi * tq + lax.broadcasted_iota(jnp.int32, sd.shape, 0)
        col = lax.broadcasted_iota(jnp.int32, sd.shape, 1)
        sd = jnp.where(col > row, -jnp.inf, sd)

    # ---- exact in-kernel top-k over the prefix axis (threshold formulation) --
    # Each iteration removes the current row max (1 XLU reduction + 1 cmp +
    # 1 select); after `topk` iterations the removed set is the top-k set.
    work = sp
    for _ in range(topk):                                  # topk is small & static
        m = jnp.max(work, axis=-1, keepdims=True)
        work = jnp.where(work >= m, -jnp.inf, work)
    sel_mask = jnp.where(work == -jnp.inf, jnp.float32(1.0), jnp.float32(0.0))

    # ---- combined softmax over {top-k prefix} U {dense suffix} scores --------
    # max-subtracted: mathematically identical to exp()/sum(exp()), but safe.
    m_all = jnp.maximum(jnp.max(sp, axis=-1, keepdims=True),
                        jnp.max(sd, axis=-1, keepdims=True))
    p_sp = jnp.exp(sp - m_all) * sel_mask                  # (tq, Npref)
    p_sd = jnp.exp(sd - m_all)                             # (tq, T)
    denom = (jnp.sum(p_sp, axis=-1, keepdims=True)
             + jnp.sum(p_sd, axis=-1, keepdims=True))
    inv = pl.reciprocal(denom, approx=False)               # (tq,1): exact is free

    a_sp = (p_sp * inv).astype(jnp.bfloat16)
    a_sd = (p_sd * inv).astype(jnp.bfloat16)

    # sparse part == masked-probs @ prefix V (MXU) -- replaces the HBM gather
    out = (jnp.dot(a_sp, pv, preferred_element_type=jnp.float32)
           + jnp.dot(a_sd, vs, preferred_element_type=jnp.float32))
    o_ref[...] = out.astype(o_ref.dtype)


def fused_topk_attn_pallas(qkv, pk, pv, cos, sin, *, B, T, H, kvH, D,
                           topk, causal, tq, scale):
    """qkv: (B*T, (H+2*kvH)*D) bf16 projection output; pk/pv: (B*kvH, Npref, D).

    Head indexing happens in the index_maps (column blocks of the 2-D
    projection layout), so no transposes are needed between kernels.  The grid
    is (B*kvH, G, nqt) so a megacore split never splits a kv group and the
    pk/pv block index only changes on the outermost axis (no re-DMA inside).
    """
    nqt = T // tq
    G = H // kvH
    Npref = pk.shape[1]
    kernel = functools.partial(_topk_attn_kernel, topk=topk, causal=causal,
                               tq=tq, scale=scale)

    def q_map(bk, g, qi):
        return ((bk // kvH) * nqt + qi, (bk % kvH) * G + g)

    def k_map(bk, g, qi):
        return (bk // kvH, H + bk % kvH)

    def v_map(bk, g, qi):
        return (bk // kvH, H + kvH + bk % kvH)

    def p_map(bk, g, qi):
        return (bk, 0, 0)

    def cs_map(bk, g, qi):
        return (0, 0)

    per_step = (2 * tq * D * 2                 # q block (double-buffered bf16)
                + 2 * 2 * T * D * 2            # k, v blocks
                + 2 * 2 * Npref * D * 2        # pk, pv blocks
                + 2 * 2 * T * D * 4            # cos, sin (f32)
                + 2 * tq * D * 2               # out block (bf16)
                + 6 * tq * Npref * 4           # live (tq, Npref) f32 intermediates
                + 4 * tq * T * 4)              # live (tq, T) f32 intermediates
    return pl.pallas_call(
        kernel,
        out_shape=jax.ShapeDtypeStruct((B * T, H * D), jnp.bfloat16),
        grid=(B * kvH, G, nqt),
        in_specs=[
            pl.BlockSpec((tq, D), q_map),
            pl.BlockSpec((T, D), k_map),
            pl.BlockSpec((T, D), v_map),
            pl.BlockSpec((1, Npref, D), p_map),
            pl.BlockSpec((1, Npref, D), p_map),
            pl.BlockSpec((T, D), cs_map),
            pl.BlockSpec((T, D), cs_map),
        ],
        out_specs=pl.BlockSpec((tq, D), q_map),
        compiler_params=pltpu.CompilerParams(
            dimension_semantics=("parallel", "parallel", "parallel"),
            vmem_limit_bytes=_vmem_limit(per_step)),
    )(qkv, qkv, qkv, pk, pv, cos, sin)


# ----------------------------------------------------------------------------
# JAX glue (RoPE tables, weight prep) — no transposes, no gathers per call
# ----------------------------------------------------------------------------
def rope_cos_sin(positions, head_dim, base=10000.0):
    inv_freq = 1.0 / (base ** (jnp.arange(0, head_dim, 2, dtype=jnp.float32)
                               / head_dim))
    freqs = positions.astype(jnp.float32)[:, None] * inv_freq[None, :]
    emb = jnp.concatenate([freqs, freqs], axis=-1)            # (T, D)
    return jnp.cos(emb), jnp.sin(emb)


def apply_rope(x, cos, sin):
    # x: (B, T, Hx, D); cos/sin: (T, D).  Matches transformers apply_rotary_pos_emb.
    d = x.shape[-1]
    x1, x2 = x[..., : d // 2], x[..., d // 2:]
    rot = jnp.concatenate([-x2, x1], axis=-1)
    return x * cos[None, :, None, :] + rot * sin[None, :, None, :]


def prepare_params(params):
    """One-time weight prep: concat + transpose + bf16 cast (out of the hot path)."""
    Wq, Wk, Wv, Wo = params["Wq"], params["Wk"], params["Wv"], params["Wo"]
    return {
        "w_qkv_t": jnp.concatenate([Wq, Wk, Wv], axis=0).T.astype(jnp.bfloat16),
        "wo_t": Wo.T.astype(jnp.bfloat16),
        "n_q_features": Wq.shape[0],
    }


def topk_attention_forward(hidden_states, prefix_key, prefix_value, prepped,
                           topk_k, num_prev_seen_tokens):
    """Pallas implementation of TopkAttention.forward.

    hidden_states: (B, T, hidden)
    prefix_key / prefix_value: (B, kvH, Npref, D) — the prefix key tensor plays
    the role of the FAISS inner-product database (exact IP search).
    """
    B, T, hidden = hidden_states.shape
    kvH = prefix_key.shape[1]
    D = prefix_key.shape[-1]
    Npref = prefix_key.shape[2]
    H = prepped["n_q_features"] // D
    topk_k = min(topk_k, Npref)

    # fused QKV projection: one pallas matmul, bf16 output (RoPE is in-kernel)
    x2d = hidden_states.reshape(B * T, hidden).astype(jnp.bfloat16)
    qkv = linear_pallas(x2d, prepped["w_qkv_t"], out_dtype=jnp.bfloat16)

    positions = num_prev_seen_tokens + jnp.arange(T)
    cos, sin = rope_cos_sin(positions, D)                     # (T, D) f32

    pk = prefix_key.astype(jnp.bfloat16).reshape(B * kvH, Npref, D)
    pv = prefix_value.astype(jnp.bfloat16).reshape(B * kvH, Npref, D)

    tq = _pick_tile(T, (128, 64, 32, 16, 8))
    # TODO(synk): for very long prefix caches (Npref*D bf16 approaching VMEM),
    # tile the prefix axis with a streaming top-k merge + online softmax and
    # tile the dense suffix axis for long-T prefill; here the full (Npref, D)
    # prefix tile is resident per kv-head.
    out2d = fused_topk_attn_pallas(
        qkv, pk, pv, cos, sin, B=B, T=T, H=H, kvH=kvH, D=D,
        topk=topk_k, causal=(T > 1), tq=tq, scale=1.0 / math.sqrt(D))

    attn_out = linear_pallas(out2d, prepped["wo_t"]).reshape(B, T, hidden)
    return attn_out


# ----------------------------------------------------------------------------
# Pure-JAX reference (mirrors the torch math, same bf16 quantization points)
# ----------------------------------------------------------------------------
def repeat_kv(x, n_rep):
    if n_rep == 1:
        return x
    b, h, n, d = x.shape
    return jnp.broadcast_to(x[:, :, None], (b, h, n_rep, n, d)).reshape(
        b, h * n_rep, n, d)


def reference_forward(hidden_states, prefix_key, prefix_value, params,
                      topk_k, num_prev_seen_tokens):
    Wq, Wk, Wv, Wo = params["Wq"], params["Wk"], params["Wv"], params["Wo"]
    B, T, hidden = hidden_states.shape
    kvH = prefix_key.shape[1]
    D = prefix_key.shape[-1]
    H = Wq.shape[0] // D
    G = H // kvH
    Npref = prefix_key.shape[2]
    topk_k = min(topk_k, Npref)

    def mm(a, b):
        return jnp.dot(a.astype(jnp.bfloat16), b.astype(jnp.bfloat16),
                       preferred_element_type=jnp.float32)

    x2d = hidden_states.reshape(B * T, hidden)
    # mirror the kernel's bf16 QKV intermediate (same quantization points)
    q = mm(x2d, Wq.T).astype(jnp.bfloat16).astype(jnp.float32).reshape(B, T, H, D)
    k = mm(x2d, Wk.T).astype(jnp.bfloat16).astype(jnp.float32).reshape(B, T, kvH, D)
    v = mm(x2d, Wv.T).astype(jnp.bfloat16).reshape(B, T, kvH, D)
    positions = num_prev_seen_tokens + jnp.arange(T)
    cos, sin = rope_cos_sin(positions, D)
    q = apply_rope(q, cos, sin)
    k = apply_rope(k, cos, sin)

    scale = 1.0 / math.sqrt(D)
    q_f = (q * scale).astype(jnp.bfloat16).transpose(0, 2, 1, 3).reshape(B * H, T, D)
    suffix_k = repeat_kv(k.astype(jnp.bfloat16).transpose(0, 2, 1, 3), G).reshape(B * H, T, D)
    suffix_v = repeat_kv(v.transpose(0, 2, 1, 3), G).reshape(B * H, T, D)
    pk_rep = repeat_kv(prefix_key, G).astype(jnp.bfloat16).reshape(B * H, Npref, D)
    pv_f = prefix_value.astype(jnp.bfloat16).reshape(B * kvH, Npref, D)

    sp = jnp.einsum("bqd,bkd->bqk", q_f, pk_rep,
                    preferred_element_type=jnp.float32)
    topk_vals, topk_idx = jax.lax.top_k(sp, topk_k)
    # head -> kv-head map (torch code assumes B == 1; general form used here)
    bh = jnp.arange(B * H)
    i_kv = (bh // H) * kvH + (bh % H) // G
    tvs = pv_f[i_kv[:, None, None], topk_idx]                # (BH, T, K, D)

    sd = jnp.einsum("bqd,bkd->bqk", q_f, suffix_k,
                    preferred_element_type=jnp.float32)
    if T > 1:
        mask = jnp.triu(jnp.ones((T, T), dtype=bool), 1)
        sd = jnp.where(mask[None], -jnp.inf, sd)
    pd = jnp.exp(sd)
    ps = jnp.exp(topk_vals)
    denom = ps.sum(-1) + pd.sum(-1)
    attn_dense = (pd / denom[..., None]).astype(jnp.bfloat16)
    attn_sparse = (ps / denom[..., None]).astype(jnp.bfloat16)
    xhat = (jnp.einsum("bqk,bqkd->bqd", attn_sparse, tvs,
                       preferred_element_type=jnp.float32)
            + jnp.einsum("bqk,bkd->bqd", attn_dense, suffix_v,
                         preferred_element_type=jnp.float32))
    out = xhat.reshape(B, H, T, D).transpose(0, 2, 1, 3).reshape(B * T, H * D)
    return mm(out, Wo.T).reshape(B, T, hidden)


# ----------------------------------------------------------------------------
if __name__ == "__main__":
    # Small but lane-aligned shapes (D = 128 keeps every vreg/MXU lane dense).
    B, H, KVH, D = 1, 4, 2, 128
    HIDDEN = H * D            # 512
    T = 8                     # suffix length (current query tokens)
    NPREF = 128               # prefix (cached) tokens in the "FAISS" db
    TOPK = 8

    key = jax.random.PRNGKey(0)
    k_hs, k_pk, k_pv, k_wq, k_wk, k_wv, k_wo = jax.random.split(key, 7)

    hidden_states = jax.random.normal(k_hs, (B, T, HIDDEN), jnp.float32)
    prefix_key = jax.random.normal(k_pk, (B, KVH, NPREF, D), jnp.float32)
    prefix_value = jax.random.normal(k_pv, (B, KVH, NPREF, D), jnp.float32)

    def init_w(k, out_f, in_f):
        return jax.random.normal(k, (out_f, in_f), jnp.float32) / math.sqrt(in_f)

    params = {
        "Wq": init_w(k_wq, H * D, HIDDEN),
        "Wk": init_w(k_wk, KVH * D, HIDDEN),
        "Wv": init_w(k_wv, KVH * D, HIDDEN),
        "Wo": init_w(k_wo, HIDDEN, H * D),
    }
    prepped = prepare_params(params)   # one-time bf16 / transpose weight prep

    out = topk_attention_forward(hidden_states, prefix_key, prefix_value,
                                 prepped, topk_k=TOPK,
                                 num_prev_seen_tokens=NPREF)
    out = jax.block_until_ready(out)

    ref = reference_forward(hidden_states, prefix_key, prefix_value, params,
                            topk_k=TOPK, num_prev_seen_tokens=NPREF)
    assert out.shape == (B, T, HIDDEN)
    assert bool(jnp.allclose(out, ref, rtol=2e-2, atol=2e-2)), \
        "mismatch vs reference"

    print("KERNEL_OK")
</pallas_src>

<mosaic_0001>
module attributes {stable_mosaic.version = 11 : i64} {
  func.func @_matmul_kernel(%arg0: i32, %arg1: i32, %arg2: i32, %arg3: memref<8x512xbf16, #tpu.memory_space<vmem>>, %arg4: memref<512x512xbf16, #tpu.memory_space<vmem>>, %arg5: memref<8x512xbf16, #tpu.memory_space<vmem>>, %arg6: memref<8x512xf32, #tpu.memory_space<vmem>>) attributes {dimension_semantics = [#tpu.dimension_semantics<parallel>, #tpu.dimension_semantics<parallel>, #tpu.dimension_semantics<arbitrary>], iteration_bounds = array<i64: 1, 2, 1>, scalar_prefetch = 0 : i64, scratch_operands = 1 : i64, tpu.core_type = #tpu.core_type<tc>, window_params = [{transform_indices = @transform_0, window_bounds = array<i64: 8, 512>}, {transform_indices = @transform_1, window_bounds = array<i64: 512, 512>}, {transform_indices = @transform_2, window_bounds = array<i64: 8, 512>}]} {
    %c0_i32 = arith.constant 0 : i32
    %0 = arith.cmpi eq, %arg2, %c0_i32 : i32
    %1 = arith.extui %0 : i1 to i32
    %c0_i32_0 = arith.constant 0 : i32
    %2 = arith.cmpi ne, %1, %c0_i32_0 : i32
    scf.if %2 {
      %cst_10 = arith.constant 0.000000e+00 : f32
      %12 = vector.broadcast %cst_10 : f32 to vector<8x512xf32>
      %c0_11 = arith.constant 0 : index
      %c0_12 = arith.constant 0 : index
      %13 = vector.load %arg6[%c0_11, %c0_12] : memref<8x512xf32, #tpu.memory_space<vmem>>, vector<8x512xf32>
      tpu.vector_store %arg6[%c0_11, %c0_12], %12 {strides = array<i32>} : memref<8x512xf32, #tpu.memory_space<vmem>>, vector<8x512xf32>,
    } else {
    }
    %c0 = arith.constant 0 : index
    %c0_1 = arith.constant 0 : index
    %3 = vector.load %arg6[%c0, %c0_1] : memref<8x512xf32, #tpu.memory_space<vmem>>, vector<8x512xf32>
    %c0_2 = arith.constant 0 : index
    %c0_3 = arith.constant 0 : index
    %4 = vector.load %arg3[%c0_2, %c0_3] : memref<8x512xbf16, #tpu.memory_space<vmem>>, vector<8x512xbf16>
    %c0_4 = arith.constant 0 : index
    %c0_5 = arith.constant 0 : index
    %5 = vector.load %arg4[%c0_4, %c0_5] : memref<512x512xbf16, #tpu.memory_space<vmem>>, vector<512x512xbf16>
    %cst = arith.constant dense<0.000000e+00> : vector<8x512xf32>
    %6 = tpu.matmul %4, %5, %cst {dimension_numbers = #tpu.dot_dimension_numbers<[1], [0], [0], [1], [0, 0, 1, 1], [], []>} : vector<8x512xbf16>, vector<512x512xbf16>, vector<8x512xf32> -> vector<8x512xf32>
    %7 = arith.addf %3, %6 : vector<8x512xf32>
    %c0_6 = arith.constant 0 : index
    %c0_7 = arith.constant 0 : index
    %8 = vector.load %arg6[%c0_6, %c0_7] : memref<8x512xf32, #tpu.memory_space<vmem>>, vector<8x512xf32>
    tpu.vector_store %arg6[%c0_6, %c0_7], %7 {strides = array<i32>} : memref<8x512xf32, #tpu.memory_space<vmem>>, vector<8x512xf32>,
    %c0_i32_8 = arith.constant 0 : i32
    %9 = arith.cmpi eq, %arg2, %c0_i32_8 : i32
    %10 = arith.extui %9 : i1 to i32
    %c0_i32_9 = arith.constant 0 : i32
    %11 = arith.cmpi ne, %10, %c0_i32_9 : i32
    scf.if %11 {
      %c0_10 = arith.constant 0 : index
      %c0_11 = arith.constant 0 : index
      %12 = vector.load %arg6[%c0_10, %c0_11] : memref<8x512xf32, #tpu.memory_space<vmem>>, vector<8x512xf32>
      %13 = arith.truncf %12 : vector<8x512xf32> to vector<8x512xbf16>
      %c0_12 = arith.constant 0 : index
      %c0_13 = arith.constant 0 : index
      %14 = vector.load %arg5[%c0_12, %c0_13] : memref<8x512xbf16, #tpu.memory_space<vmem>>, vector<8x512xbf16>
      tpu.vector_store %arg5[%c0_12, %c0_13], %13 {strides = array<i32>} : memref<8x512xbf16, #tpu.memory_space<vmem>>, vector<8x512xbf16>,
    } else {
    }
    return
  }
  func.func @transform_0(%arg0: i32, %arg1: i32, %arg2: i32) -> (i32, i32) {
    %c0_i32 = arith.constant 0 : i32
    return %arg0, %arg2 : i32, i32
  }
  func.func @transform_1(%arg0: i32, %arg1: i32, %arg2: i32) -> (i32, i32) {
    %c0_i32 = arith.constant 0 : i32
    return %arg2, %arg1 : i32, i32
  }
  func.func @transform_2(%arg0: i32, %arg1: i32, %arg2: i32) -> (i32, i32) {
    %c0_i32 = arith.constant 0 : i32
    return %arg0, %arg1 : i32, i32
  }
}

</mosaic_0001>

<bundles_post_ra>
// kernel: tpu_custom_call.1
= control target key start
LH: loop header
LB: loop body
LE: loop exit
PB: predicated region body
PF: predicated region fallthrough
CT: control target
= control target key end

     0   :  { %7 = vsyncpa [#allocation4], 0  ;;  %s2289_s0 = inlined_call_operand.hbm [shape: bf16[8,512], index: 0, kind: input, shape index: {}]   ;;  %s2290_s1 = inlined_call_operand.hbm [shape: bf16[512,1024], index: 1, kind: input, shape index: {}]   ;;  %s2291_s2 = inlined_call_operand.hbm [shape: bf16[8,1024], index: 2, kind: output, shape index: {}]  }
   0x1   :  { %8 = vsyncpa [#allocation7], 0 }
   0x2   :  { %10 = vsyncpa [#allocation7 + $0x1], 0 }
   0x3   :  { %11 = vsyncpa [#allocation5], 0 }
   0x4   :  { %13 = vsyncpa [#allocation5 + $0x1], 0  ;;  %s1933_s9 = smov 0   ;;  %s1935_s10 = smov 0  }
   0x5   :  { %s1937_s11 = smov 0   ;;  %s1939_s12 = smov 0  }
   0x6   :  { %s1941_s13 = smov 0   ;;  %s1943_s14 = smov 0  }
   0x7 LB: > { %s1331_s15 = sadd.s32 4294967295, %s1910_s14   ;;  %s1332_s16 = sadd.s32 4294967294, %s1910_s14   ;;  %s1910_s14 = sphi %s1943_s14, %s19_s14   ;;  %s1906_s13 = sphi %s1941_s13, %s2319_s13   ;;  %s1902_s12 = sphi %s1939_s12, %s2318_s12   ;;  %s1898_s11 = sphi %s1937_s11, %s2317_s11   ;;  %s1894_s10 = sphi %s1935_s10, %s2316_s10   ;;  %s1890_s9 = sphi %s1933_s9, %s2315_s9  }
   0x8   : > { %s75_s17 = sadd.s32 1, %s1898_s11  ;;  %p82_p0 = scmp.ne.s32.totalorder %s1898_s11, %s1894_s10 }
   0x9   : > { %p83_p1 = scmp.eq.s32.totalorder %s1910_s14, 0  ;;  %p88_p2 = scmp.ne.s32.totalorder %s1894_s10, %s1890_s9 }
   0xa   : > { %p1971_p3 = scmp.eq.s32.totalorder %s1331_s15, 0  ;;  %p114_p4 = scmp.eq.s32.totalorder %s1331_s15, 1 }
   0xb   : > { %p1975_p5 = por %p83_p1, %p82_p0  ;;  %p120_p6 = scmp.eq.s32.totalorder %s1332_s16, 1 }
   0xc   : > { %s2298_s18 = scalar_select %p1971_p3, 1, 0 }
   0xd   : > { %p1981_p7 = por %p1971_p3, %p88_p2  ;;  %p1985_p8 = por %p114_p4, %p82_p0 }
   0xe   : > { %p1989_p9 = por %p120_p6, %p88_p2  ;;  %p1333_p10 = scmp.ge.s32.totalorder %s1910_s14, 1 }
   0xf   : > { %s2300_s20 = scalar_select %p1981_p7, 1, 0 }
  0x10   : > { %s2301_s21 = scalar_select %p1985_p8, 1, 0 }
  0x11   : > { %s2302_s22 = scalar_select %p1989_p9, 1, 0 }
  0x12   : > { %p127_p11 = scmp.lt.s32.totalorder %s1910_s14, 3  ;;  %s1912_s24 = smov [#allocation3]  }
  0x13   : > { %s145_s25 = sshll.u32 %s1912_s24, 4  ;;  %p1515_p1 = scmp.lt.s32.totalorder %s1910_s14, 2  ;;  %s146_s25 = int_to_ptr.vmem [resolvable:$true] %s145_s25 }
  0x14   : > { %p1996_p13 = pnand %p1333_p10, %p127_p11  ;;  %s34_s28 = sadd.s32 1, %s1906_s13 }
  0x15   : > { %p2005_p4 = pnand %p1515_p1, %p1975_p5  ;;  %p2016_p6 = scmp.ge.s32.totalorder %s34_s28, 2 }
  0x16   : > { %s2303_s23 = scalar_select %p1996_p13, 1, 0 }
  0x17   : > { %p1502_p0 = pneg %p1996_p13  ;;  %s156_s30 = sand.u32 1, %s1898_s11  }
  0x18   : > { %s2304_s26 = scalar_select %p2005_p4, 1, 0 }
  0x19   : > { %p2011_p2 = pnand %p1502_p0, %p1971_p3  ;;  %s1766_s5 = scalar_lea.hbm %s2289_s0, 256 }
  0x1a   : > { %s2306_s29 = scalar_select %p2016_p6, 1, 0 }
  0x1b   : > { %p1767_p5 = scmp.ne.s32.totalorder %s2289_s0, %s1766_s5  ;;  %p1768_p10 = pneg %p2011_p2 }
  0x1c   : > { %p1773_p0 = scmp.lt.u32.totalorder %s1766_s5, %s2289_s0 }
  0x1d   : > { %p1769_p11 = pnand %p1768_p10, %p1767_p5 }
  0x1f   : > { %p1770_p1 = pneg %p1769_p11 }
  0x21   : > { %p1775_p12 = pnand %p1773_p0, %p1770_p1 }
  0x23   : > { %1778 = shalt.err (!%p1775_p12)
}
  0x24   : > { %s1779_s16 = scalar_lea.vmem %s146_s25, 256  ;;  %p1787_p3 = scmp.lt.s32.totalorder %s146_s25, %s146_s25 }
  0x25   : > { %p1780_p9 = scmp.ne.s32.totalorder %s146_s25, %s1779_s16  ;;  %p1788_p13 = scmp.lt.s32.totalorder %s1779_s16, %s1779_s16 }
  0x27   : > { %p1782_p8 = pnand %p1780_p9, %p1768_p10  ;;  %p1789_p4 = por %p1788_p13, %p1787_p3 }
  0x29   : > { %p1783_p7 = pneg %p1782_p8 }
  0x2b   : > { %p1790_p6 = pnand %p1789_p4, %p1783_p7 }
  0x2d   : > { %1793 = shalt.err (!%p1790_p6)
}
  0x2e   : > { %1505 = dma.hbm_to_vmem [thread:$0]  (!%p2011_p2), %s2289_s0, 256, %s146_s25, [#allocation4]  }
  0x2f   : > { %p2307_p9 = scmp.ne.s32.totalorder %s2306_s29, 0  ;;  %s1336_s3 = sshll.u32 %s156_s30, 10 }
  0x30   : > { %s1482_s5 = sshll.u32 %s1906_s13, 8  ;;  %s160_s8 = scalar_lea.vmem [#allocation6], %s1336_s3 }
  0x31   : > { %s2321_s28 = smov (%p2307_p9, %s34_s28), 0  ;;  %s2047_s7 = scalar_lea.hbm %s2290_s1, %s1482_s5 }
  0x32   : > { %s71_s4 = ssub.s32 %s1906_s13, %s2321_s28  ;;  %s170_s15 = sshll.u32 %s160_s8, 4  ;;  %s2054_s15 = int_to_ptr.vmem [resolvable:$true] %s170_s15 }
  0x33   : > { %p73_p3 = scmp.eq.s32.totalorder %s71_s4, 0  ;;  %s2056_s29 = scalar_lea.sflag [#allocation7], %s156_s30 }
  0x34   : > { %s1794_s16 = scalar_lea.hbm %s2047_s7, 16384  ;;  %p2308_p8 = scmp.ne.s32.totalorder %s2304_s26, 0 }
  0x35   : > { %s2052_s25 = scalar_select %p73_p3, %s1898_s11, %s75_s17  }
  0x36   : > { %p1795_p7 = scmp.ne.s32.totalorder %s2047_s7, %s1794_s16  ;;  %p1796_p12 = pneg %p2308_p8 }
  0x37   : > { %s1799_s3 = scalar_lea.hbm %s2290_s1, 32768  ;;  %p1800_p2 = scmp.lt.u32.totalorder %s2047_s7, %s2290_s1 }
  0x38   : > { %p1797_p13 = pnand %p1796_p12, %p1795_p7  ;;  %p1801_p6 = scmp.lt.u32.totalorder %s1799_s3, %s1794_s16 }
  0x39   : > { %p1803_p10 = scmp.lt.u32.totalorder %s1794_s16, %s2047_s7 }
  0x3a   : > { %p1798_p4 = pneg %p1797_p13  ;;  %p1802_p5 = por %p1801_p6, %p1800_p2 }
  0x3c   : > { %p1804_p11 = por %p1803_p10, %p1802_p5 }
  0x3e   : > { %p1805_p1 = pnand %p1804_p11, %p1798_p4 }
  0x40   : > { %1808 = shalt.err (!%p1805_p1)
}
  0x41   : > { %s1809_s17 = scalar_lea.vmem %s2054_s15, 16384  ;;  %s1913_s30 = smov [#allocation6]  }
  0x42   : > { %p1810_p0 = scmp.ne.s32.totalorder %s2054_s15, %s1809_s17  ;;  %s1814_s27 = sshll.u32 %s1913_s30, 4  ;;  %s1815_s27 = int_to_ptr.vmem [resolvable:$false] %s1814_s27 }
  0x43   : > { %s1816_s6 = scalar_lea.vmem %s1815_s27, 32768  ;;  %p1817_p7 = scmp.lt.s32.totalorder %s2054_s15, %s1815_s27 }
  0x44   : > { %p1812_p9 = pnand %p1810_p0, %p1796_p12  ;;  %p1818_p13 = scmp.lt.s32.totalorder %s1816_s6, %s1809_s17 }
  0x46   : > { %p1813_p3 = pneg %p1812_p9  ;;  %p1819_p2 = por %p1818_p13, %p1817_p7 }
  0x48   : > { %p1820_p6 = pnand %p1819_p2, %p1813_p3 }
  0x4a   : > { %1823 = shalt.err (!%p1820_p6)
}
  0x4b   : > { %s1914_s8 = smov 512   ;;  %s1915_s16 = smov 256  }
  0x4c   : > { %s1916_s19 = smov 16   ;;  %p2309_p12 = scmp.ne.s32.totalorder %s2303_s23, 0 }
  0x4d   : > { %1509 = dma.hbm_to_vmem [thread:$0]  (!%p2308_p8), %s2047_s7, 16384, %s2054_s15, %s2056_s29, %s1914_s8, %s1915_s16, %s1916_s19  }
  0x4e   : > { %182 = sbr.rel (%p2309_p12) target bundleno = 448 (0x1c0), region = 28  ;;  %p2310_p4 = scmp.ne.s32.totalorder (!%p2309_p12), %s2298_s18, 0 }
  0x55   : > { %1877 = dma.done.wait (%p2310_p4), [#allocation4], 256  }
  0x56   : > { %1879 = vsyncadd (%p2310_p4), [#allocation4], 4294967040  ;;  %s2091_s24 = sand.u32 1, %s1894_s10   ;;  %p2311_p8 = scmp.ne.s32.totalorder %s2300_s20, 0 }
  0x57   : > { %s1341_s3 = sshll.u32 %s2091_s24, 10  ;;  %s189_s4 = scalar_lea.sflag [#allocation7], %s2091_s24 }
  0x58   : > { %s2095_s5 = scalar_lea.vmem [#allocation6], %s1341_s3 }
  0x59   : > { %1881 = dma.done.wait (%p2311_p8), %s189_s4, 16384  }
  0x5a   : > { %1883 = vsyncadd (%p2311_p8), %s189_s4, 4294950912  ;;  %v1570_v0 = vld [vmem:[%s2095_s5 + $0x4] ss:$16 sps:$4 sm:$0xff]   ;;  %v1572_v1 = vld [vmem:[%s2095_s5 + $0xc] ss:$16 sps:$4 sm:$0xff]   ;;  %s1342_s18 = sshll.u32 %s2091_s24, 4 }
  0x5b   : > { %1013 = vmatprep.subr.bf16.mxu0 %v1570_v0  ;;  %v1574_v2 = vld [vmem:[%s2095_s5] ss:$16 sps:$4 sm:$0xff]   ;;  %v1575_v3 = vld [vmem:[%s2095_s5 + $0x8] ss:$16 sps:$4 sm:$0xff]   ;;  %1095 = vmatprep.subr.bf16.mxu1 %v1572_v1  ;;  %v1576_v4 = vld [vmem:[%s2095_s5 + $0x24] ss:$16 sps:$4 sm:$0xff]  }
  0x5c   : > { %1014 = vmatpush1.bf16.msra.mxu0 %v1574_v2  ;;  %1096 = vmatpush1.bf16.msra.mxu1 %v1575_v3  ;;  %v1578_v5 = vld [vmem:[%s2095_s5 + $0x2c] ss:$16 sps:$4 sm:$0xff]   ;;  %v1580_v6 = vld [vmem:[%s2095_s5 + $0x20] ss:$16 sps:$4 sm:$0xff]   ;;  %v1581_v7 = vld [vmem:[%s2095_s5 + $0x28] ss:$16 sps:$4 sm:$0xff]  }
  0x5d   : > { %1015 = vmatprep.subr.bf16.mxu0 %v1576_v4  ;;  %1097 = vmatprep.subr.bf16.mxu1 %v1578_v5  ;;  %v1582_v8 = vld [vmem:[%s2095_s5 + $0x44] ss:$16 sps:$4 sm:$0xff]   ;;  %v1584_v9 = vld [vmem:[%s2095_s5 + $0x4c] ss:$16 sps:$4 sm:$0xff]   ;;  %v1586_v10 = vld [vmem:[%s2095_s5 + $0x40] ss:$16 sps:$4 sm:$0xff]  }
  0x5e   : > { %v1587_v11 = vld [vmem:[%s2095_s5 + $0x48] ss:$16 sps:$4 sm:$0xff]   ;;  %v1588_v12 = vld [vmem:[%s2095_s5 + $0x64] ss:$16 sps:$4 sm:$0xff]   ;;  %v1590_v13 = vld [vmem:[%s2095_s5 + $0x6c] ss:$16 sps:$4 sm:$0xff]  }
  0x5f   : > { %v1592_v14 = vld [vmem:[%s2095_s5 + $0x60] ss:$16 sps:$4 sm:$0xff]   ;;  %v1593_v15 = vld [vmem:[%s2095_s5 + $0x68] ss:$16 sps:$4 sm:$0xff]   ;;  %v1594_v16 = vld [vmem:[%s2095_s5 + $0x84] ss:$16 sps:$4 sm:$0xff]  }
  0x60   : > { %1016 = vmatpush1.bf16.msra.mxu0 %v1580_v6  ;;  %1098 = vmatpush1.bf16.msra.mxu1 %v1581_v7  ;;  %v1596_v17 = vld [vmem:[%s2095_s5 + $0x8c] ss:$16 sps:$4 sm:$0xff]   ;;  %v1598_v18 = vld [vmem:[%s2095_s5 + $0x80] ss:$16 sps:$4 sm:$0xff]   ;;  %v1599_v19 = vld [vmem:[%s2095_s5 + $0x88] ss:$16 sps:$4 sm:$0xff]  }
  0x61   : > { %1017 = vmatprep.subr.bf16.mxu0 %v1582_v8  ;;  %1099 = vmatprep.subr.bf16.mxu1 %v1584_v9  ;;  %v1600_v20 = vld [vmem:[%s2095_s5 + $0xa4] ss:$16 sps:$4 sm:$0xff]   ;;  %v1602_v21 = vld [vmem:[%s2095_s5 + $0xac] ss:$16 sps:$4 sm:$0xff]   ;;  %v1604_v22 = vld [vmem:[%s2095_s5 + $0xa0] ss:$16 sps:$4 sm:$0xff]  }
  0x62   : > { %v1605_v23 = vld [vmem:[%s2095_s5 + $0xa8] ss:$16 sps:$4 sm:$0xff]   ;;  %v1606_v24 = vld [vmem:[%s2095_s5 + $0xc4] ss:$16 sps:$4 sm:$0xff]   ;;  %v1608_v25 = vld [vmem:[%s2095_s5 + $0xcc] ss:$16 sps:$4 sm:$0xff]  }
  0x63   : > { %v1610_v26 = vld [vmem:[%s2095_s5 + $0xc0] ss:$16 sps:$4 sm:$0xff]   ;;  %v1611_v27 = vld [vmem:[%s2095_s5 + $0xc8] ss:$16 sps:$4 sm:$0xff]   ;;  %v1612_v28 = vld [vmem:[%s2095_s5 + $0xe4] ss:$16 sps:$4 sm:$0xff]  }
  0x64   : > { %1018 = vmatpush1.bf16.msra.mxu0 %v1586_v10  ;;  %1100 = vmatpush1.bf16.msra.mxu1 %v1587_v11  ;;  %v1614_v29 = vld [vmem:[%s2095_s5 + $0xec] ss:$16 sps:$4 sm:$0xff]   ;;  %v1616_v30 = vld [vmem:[%s2095_s5 + $0xe0] ss:$16 sps:$4 sm:$0xff]   ;;  %v1617_v31 = vld [vmem:[%s2095_s5 + $0xe8] ss:$16 sps:$4 sm:$0xff]  }
  0x65   : > { %1019 = vmatprep.subr.bf16.mxu0 %v1588_v12  ;;  %1101 = vmatprep.subr.bf16.mxu1 %v1590_v13  ;;  %v1618_v32 = vld [vmem:[%s2095_s5 + $0x104] ss:$16 sps:$4 sm:$0xff]   ;;  %v1620_v33 = vld [vmem:[%s2095_s5 + $0x10c] ss:$16 sps:$4 sm:$0xff]   ;;  %v1622_v34 = vld [vmem:[%s2095_s5 + $0x100] ss:$16 sps:$4 sm:$0xff]  }
  0x66   : > { %v1623_v35 = vld [vmem:[%s2095_s5 + $0x108] ss:$16 sps:$4 sm:$0xff]   ;;  %v1624_v36 = vld [vmem:[%s2095_s5 + $0x124] ss:$16 sps:$4 sm:$0xff]   ;;  %v1626_v37 = vld [vmem:[%s2095_s5 + $0x12c] ss:$16 sps:$4 sm:$0xff]  }
  0x67   : > { %v1628_v38 = vld [vmem:[%s2095_s5 + $0x120] ss:$16 sps:$4 sm:$0xff]   ;;  %v1629_v39 = vld [vmem:[%s2095_s5 + $0x128] ss:$16 sps:$4 sm:$0xff]   ;;  %v1630_v40 = vld [vmem:[%s2095_s5 + $0x144] ss:$16 sps:$4 sm:$0xff]  }
  0x68   : > { %1020 = vmatpush1.bf16.msra.mxu0 %v1592_v14  ;;  %1102 = vmatpush1.bf16.msra.mxu1 %v1593_v15  ;;  %v1632_v41 = vld [vmem:[%s2095_s5 + $0x14c] ss:$16 sps:$4 sm:$0xff]   ;;  %v1634_v42 = vld [vmem:[%s2095_s5 + $0x140] ss:$16 sps:$4 sm:$0xff]   ;;  %v1635_v43 = vld [vmem:[%s2095_s5 + $0x148] ss:$16 sps:$4 sm:$0xff]  }
  0x69   : > { %1021 = vmatprep.subr.bf16.mxu0 %v1594_v16  ;;  %1103 = vmatprep.subr.bf16.mxu1 %v1596_v17  ;;  %v1636_v44 = vld [vmem:[%s2095_s5 + $0x164] ss:$16 sps:$4 sm:$0xff]   ;;  %v1638_v45 = vld [vmem:[%s2095_s5 + $0x16c] ss:$16 sps:$4 sm:$0xff]   ;;  %v1640_v47 = vld [vmem:[%s2095_s5 + $0x160] ss:$16 sps:$4 sm:$0xff]  }
  0x6a   : > { %v229_v46 = vld [vmem:[#allocation3] sm:$0xff]  ;;  %v1641_v49 = vld [vmem:[%s2095_s5 + $0x168] ss:$16 sps:$4 sm:$0xff]   ;;  %v1644_v51 = vld [vmem:[%s2095_s5 + $0x18c] ss:$16 sps:$4 sm:$0xff]   ;;  %s1485_s20 = sshll.u32 %s1902_s12, 8 }
  0x6b   : > { %v1344_v48 = vcombine.high %v229_v46, %v229_v46  ;;  %v1642_v50 = vld [vmem:[%s2095_s5 + $0x184] ss:$16 sps:$4 sm:$0xff]   ;;  %v1646_v52 = vld [vmem:[%s2095_s5 + $0x180] ss:$16 sps:$4 sm:$0xff]   ;;  %v1647_v53 = vld [vmem:[%s2095_s5 + $0x188] ss:$16 sps:$4 sm:$0xff]   ;;  %v1343_v4 = vcombine.low %v229_v46, %v229_v46  ;;  %s2240_s29 = scalar_lea.hbm %s2291_s2, %s1485_s20 }
  0x6c   : > { %1022 = vmatpush1.bf16.msra.mxu0 %v1598_v18  ;;  %1104 = vmatpush1.bf16.msra.mxu1 %v1599_v19  ;;  %v1648_v54 = vld [vmem:[%s2095_s5 + $0x1a4] ss:$16 sps:$4 sm:$0xff]   ;;  %v1650_v55 = vld [vmem:[%s2095_s5 + $0x1ac] ss:$16 sps:$4 sm:$0xff]   ;;  %v1652_v56 = vld [vmem:[%s2095_s5 + $0x1a0] ss:$16 sps:$4 sm:$0xff]  }
  0x6d   : > { %1023 = vmatprep.subr.bf16.mxu0 %v1600_v20  ;;  %1105 = vmatprep.subr.bf16.mxu1 %v1602_v21  ;;  %v1653_v57 = vld [vmem:[%s2095_s5 + $0x1a8] ss:$16 sps:$4 sm:$0xff]   ;;  %v1654_v58 = vld [vmem:[%s2095_s5 + $0x1c4] ss:$16 sps:$4 sm:$0xff]   ;;  %v1656_v59 = vld [vmem:[%s2095_s5 + $0x1cc] ss:$16 sps:$4 sm:$0xff]  }
  0x6e   : > { %1045 = vmatprep.mubr.bf16.mxu0 %v1344_v48  ;;  %1127 = vmatprep.mubr.bf16.mxu1 %v1344_v48  ;;  %v1658_v60 = vld [vmem:[%s2095_s5 + $0x1c0] ss:$16 sps:$4 sm:$0xff]   ;;  %v1659_v61 = vld [vmem:[%s2095_s5 + $0x1c8] ss:$16 sps:$4 sm:$0xff]   ;;  %v1660_v62 = vld [vmem:[%s2095_s5 + $0x1e4] ss:$16 sps:$4 sm:$0xff]  }
  0x6f   : > { %v1662_v63 = vld [vmem:[%s2095_s5 + $0x1ec] ss:$16 sps:$4 sm:$0xff]   ;;  %v1664_v0 = vld [vmem:[%s2095_s5 + $0x1e0] ss:$16 sps:$4 sm:$0xff]   ;;  %v1665_v1 = vld [vmem:[%s2095_s5 + $0x1e8] ss:$16 sps:$4 sm:$0xff]  }
  0x70   : > { %1024 = vmatpush1.bf16.msra.mxu0 %v1604_v22  ;;  %1106 = vmatpush1.bf16.msra.mxu1 %v1605_v23  ;;  %v1670_v2 = vld [vmem:[%s2095_s5 + $0x204] ss:$16 sps:$4 sm:$0xff]   ;;  %v1673_v3 = vld [vmem:[%s2095_s5 + $0x20c] ss:$16 sps:$4 sm:$0xff]   ;;  %v1668_v5 = vld [vmem:[%s2095_s5 + $0x200] ss:$16 sps:$4 sm:$0xff]  }
  0x71   : > { %1025 = vmatprep.subr.bf16.mxu0 %v1606_v24  ;;  %1107 = vmatprep.subr.bf16.mxu1 %v1608_v25  ;;  %v1671_v6 = vld [vmem:[%s2095_s5 + $0x208] ss:$16 sps:$4 sm:$0xff]   ;;  %v1676_v7 = vld [vmem:[%s2095_s5 + $0x224] ss:$16 sps:$4 sm:$0xff]   ;;  %v1679_v8 = vld [vmem:[%s2095_s5 + $0x22c] ss:$16 sps:$4 sm:$0xff]  }
  0x72   : > { %v1674_v9 = vld [vmem:[%s2095_s5 + $0x220] ss:$16 sps:$4 sm:$0xff]   ;;  %v1677_v10 = vld [vmem:[%s2095_s5 + $0x228] ss:$16 sps:$4 sm:$0xff]   ;;  %v1682_v11 = vld [vmem:[%s2095_s5 + $0x244] ss:$16 sps:$4 sm:$0xff]  }
  0x73   : > { %v1685_v12 = vld [vmem:[%s2095_s5 + $0x24c] ss:$16 sps:$4 sm:$0xff]   ;;  %v1680_v13 = vld [vmem:[%s2095_s5 + $0x240] ss:$16 sps:$4 sm:$0xff]   ;;  %v1683_v14 = vld [vmem:[%s2095_s5 + $0x248] ss:$16 sps:$4 sm:$0xff]  }
  0x74   : > { %1026 = vmatpush1.bf16.msra.mxu0 %v1610_v26  ;;  %1108 = vmatpush1.bf16.msra.mxu1 %v1611_v27  ;;  %v1688_v15 = vld [vmem:[%s2095_s5 + $0x264] ss:$16 sps:$4 sm:$0xff]   ;;  %v1691_v16 = vld [vmem:[%s2095_s5 + $0x26c] ss:$16 sps:$4 sm:$0xff]   ;;  %v1686_v17 = vld [vmem:[%s2095_s5 + $0x260] ss:$16 sps:$4 sm:$0xff]  }
  0x75   : > { %1027 = vmatprep.subr.bf16.mxu0 %v1612_v28  ;;  %1109 = vmatprep.subr.bf16.mxu1 %v1614_v29  ;;  %v1689_v18 = vld [vmem:[%s2095_s5 + $0x268] ss:$16 sps:$4 sm:$0xff]   ;;  %v1694_v19 = vld [vmem:[%s2095_s5 + $0x284] ss:$16 sps:$4 sm:$0xff]   ;;  %v1697_v20 = vld [vmem:[%s2095_s5 + $0x28c] ss:$16 sps:$4 sm:$0xff]  }
  0x76   : > { %v1692_v21 = vld [vmem:[%s2095_s5 + $0x280] ss:$16 sps:$4 sm:$0xff]   ;;  %v1695_v22 = vld [vmem:[%s2095_s5 + $0x288] ss:$16 sps:$4 sm:$0xff]   ;;  %v1700_v23 = vld [vmem:[%s2095_s5 + $0x2a4] ss:$16 sps:$4 sm:$0xff]  }
  0x77   : > { %v1703_v24 = vld [vmem:[%s2095_s5 + $0x2ac] ss:$16 sps:$4 sm:$0xff]   ;;  %v1698_v25 = vld [vmem:[%s2095_s5 + $0x2a0] ss:$16 sps:$4 sm:$0xff]   ;;  %v1701_v26 = vld [vmem:[%s2095_s5 + $0x2a8] ss:$16 sps:$4 sm:$0xff]  }
  0x78   : > { %1028 = vmatpush1.bf16.msra.mxu0 %v1616_v30  ;;  %1110 = vmatpush1.bf16.msra.mxu1 %v1617_v31  ;;  %v1706_v27 = vld [vmem:[%s2095_s5 + $0x2c4] ss:$16 sps:$4 sm:$0xff]   ;;  %v1709_v28 = vld [vmem:[%s2095_s5 + $0x2cc] ss:$16 sps:$4 sm:$0xff]   ;;  %v1704_v31 = vld [vmem:[%s2095_s5 + $0x2c0] ss:$16 sps:$4 sm:$0xff]  }
  0x79   : > { %1029 = vmatprep.subr.bf16.mxu0 %v1618_v32  ;;  %1111 = vmatprep.subr.bf16.mxu1 %v1620_v33  ;;  %v2191_v29 = vld [vmem:[#allocation3 + $0x8] sm:$0xff]  ;;  %v1712_v33 = vld [vmem:[%s2095_s5 + $0x2e4] ss:$16 sps:$4 sm:$0xff]   ;;  %s212_s23 = scalar_lea.vmem [#allocation8], %s1342_s18  ;;  %s1211_s12 = scalar_lea.sflag [#allocation5], %s2091_s24 }
  0x7a   : > { %v1346_v30 = vcombine.high %v2191_v29, %v2191_v29  ;;  %v1707_v32 = vld [vmem:[%s2095_s5 + $0x2c8] ss:$16 sps:$4 sm:$0xff]   ;;  %v1733_v46 = vld [vmem:[%s2095_s5 + $0x34c] ss:$16 sps:$4 sm:$0xff]   ;;  %s1227_s26 = sshll.u32 %s212_s23, 4  ;;  %p2312_p10 = scmp.ne.s32.totalorder %s2301_s21, 0  ;;  %s2242_s26 = int_to_ptr.vmem [resolvable:$true] %s1227_s26 }
  0x7b   : > { %v1731_v48 = vld [vmem:[%s2095_s5 + $0x348] ss:$16 sps:$4 sm:$0xff]   ;;  %s1824_s17 = scalar_lea.vmem %s2242_s26, 256  ;;  %s1917_s30 = smov [#allocation8]  }
  0x7c   : > { %1030 = vmatpush1.bf16.msra.mxu0 %v1622_v34  ;;  %1112 = vmatpush1.bf16.msra.mxu1 %v1623_v35  ;;  %v1715_v34 = vld [vmem:[%s2095_s5 + $0x2ec] ss:$16 sps:$4 sm:$0xff]   ;;  %v1710_v35 = vld [vmem:[%s2095_s5 + $0x2e0] ss:$16 sps:$4 sm:$0xff]   ;;  %p1825_p5 = scmp.ne.s32.totalorder %s2242_s26, %s1824_s17  ;;  %s1828_s27 = sshll.u32 %s1917_s30, 4  ;;  %s1829_s27 = int_to_ptr.vmem [resolvable:$false] %s1828_s27 }
  0x7d   : > { %1031 = vmatprep.subr.bf16.mxu0 %v1624_v36  ;;  %1113 = vmatprep.subr.bf16.mxu1 %v1626_v37  ;;  %v1713_v36 = vld [vmem:[%s2095_s5 + $0x2e8] ss:$16 sps:$4 sm:$0xff]   ;;  %v1718_v37 = vld [vmem:[%s2095_s5 + $0x304] ss:$16 sps:$4 sm:$0xff]   ;;  %s1830_s6 = scalar_lea.vmem %s1829_s27, 512  ;;  %p1831_p0 = scmp.lt.s32.totalorder %s2242_s26, %s1829_s27 }
  0x7e   : > { %p1826_p11 = pnand %p1825_p5, %p2312_p10  ;;  %p1832_p9 = scmp.lt.s32.totalorder %s1830_s6, %s1824_s17 }
  0x80   : > { %1032 = vmatpush1.bf16.msra.mxu0 %v1628_v38  ;;  %1114 = vmatpush1.bf16.msra.mxu1 %v1629_v39  ;;  %v1721_v38 = vld [vmem:[%s2095_s5 + $0x30c] ss:$16 sps:$4 sm:$0xff]   ;;  %v1716_v39 = vld [vmem:[%s2095_s5 + $0x300] ss:$16 sps:$4 sm:$0xff]   ;;  %p1827_p1 = pneg %p1826_p11  ;;  %p1833_p3 = por %p1832_p9, %p1831_p0 }
  0x81   : > { %1033 = vmatprep.subr.bf16.mxu0 %v1630_v40  ;;  %1115 = vmatprep.subr.bf16.mxu1 %v1632_v41  ;;  %v1719_v40 = vld [vmem:[%s2095_s5 + $0x308] ss:$16 sps:$4 sm:$0xff]   ;;  %v1724_v41 = vld [vmem:[%s2095_s5 + $0x324] ss:$16 sps:$4 sm:$0xff]  }
  0x82   : > { %p1834_p7 = pnand %p1833_p3, %p1827_p1 }
  0x84   : > { %1034 = vmatpush1.bf16.msra.mxu0 %v1634_v42  ;;  %1116 = vmatpush1.bf16.msra.mxu1 %v1635_v43  ;;  %v1727_v42 = vld [vmem:[%s2095_s5 + $0x32c] ss:$16 sps:$4 sm:$0xff]   ;;  %v1722_v43 = vld [vmem:[%s2095_s5 + $0x320] ss:$16 sps:$4 sm:$0xff]  }
  0x85   : > { %1035 = vmatprep.subr.bf16.mxu0 %v1636_v44  ;;  %1117 = vmatprep.subr.bf16.mxu1 %v1638_v45  ;;  %v1725_v44 = vld [vmem:[%s2095_s5 + $0x328] ss:$16 sps:$4 sm:$0xff]   ;;  %v1730_v45 = vld [vmem:[%s2095_s5 + $0x344] ss:$16 sps:$4 sm:$0xff]  }
  0x88   : > { %1036 = vmatpush1.bf16.msra.mxu0 %v1640_v47  ;;  %1118 = vmatpush1.bf16.msra.mxu1 %v1641_v49  ;;  %v1728_v47 = vld [vmem:[%s2095_s5 + $0x340] ss:$16 sps:$4 sm:$0xff]   ;;  %v1736_v49 = vld [vmem:[%s2095_s5 + $0x364] ss:$16 sps:$4 sm:$0xff]  }
  0x89   : > { %1037 = vmatprep.subr.bf16.mxu0 %v1642_v50  ;;  %1119 = vmatprep.subr.bf16.mxu1 %v1644_v51  ;;  %v1739_v50 = vld [vmem:[%s2095_s5 + $0x36c] ss:$16 sps:$4 sm:$0xff]   ;;  %v1734_v51 = vld [vmem:[%s2095_s5 + $0x360] ss:$16 sps:$4 sm:$0xff]  }
  0x8c   : > { %1038 = vmatpush1.bf16.msra.mxu0 %v1646_v52  ;;  %1120 = vmatpush1.bf16.msra.mxu1 %v1647_v53  ;;  %v1737_v52 = vld [vmem:[%s2095_s5 + $0x368] ss:$16 sps:$4 sm:$0xff]   ;;  %v1742_v53 = vld [vmem:[%s2095_s5 + $0x384] ss:$16 sps:$4 sm:$0xff]  }
  0x8d   : > { %1039 = vmatprep.subr.bf16.mxu0 %v1648_v54  ;;  %1121 = vmatprep.subr.bf16.mxu1 %v1650_v55  ;;  %v1745_v54 = vld [vmem:[%s2095_s5 + $0x38c] ss:$16 sps:$4 sm:$0xff]   ;;  %v1740_v55 = vld [vmem:[%s2095_s5 + $0x380] ss:$16 sps:$4 sm:$0xff]  }
  0x90   : > { %1040 = vmatpush1.bf16.msra.mxu0 %v1652_v56  ;;  %1122 = vmatpush1.bf16.msra.mxu1 %v1653_v57  ;;  %v1743_v56 = vld [vmem:[%s2095_s5 + $0x388] ss:$16 sps:$4 sm:$0xff]   ;;  %v1748_v57 = vld [vmem:[%s2095_s5 + $0x3a4] ss:$16 sps:$4 sm:$0xff]  }
  0x91   : > { %1041 = vmatprep.subr.bf16.mxu0 %v1654_v58  ;;  %1123 = vmatprep.subr.bf16.mxu1 %v1656_v59  ;;  %v1751_v58 = vld [vmem:[%s2095_s5 + $0x3ac] ss:$16 sps:$4 sm:$0xff]   ;;  %v1746_v59 = vld [vmem:[%s2095_s5 + $0x3a0] ss:$16 sps:$4 sm:$0xff]  }
  0x94   : > { %1042 = vmatpush1.bf16.msra.mxu0 %v1658_v60  ;;  %1124 = vmatpush1.bf16.msra.mxu1 %v1659_v61  ;;  %v1749_v60 = vld [vmem:[%s2095_s5 + $0x3a8] ss:$16 sps:$4 sm:$0xff]   ;;  %v1754_v61 = vld [vmem:[%s2095_s5 + $0x3c4] ss:$16 sps:$4 sm:$0xff]  }
  0x95   : > { %1043 = vmatprep.subr.bf16.mxu0 %v1660_v62  ;;  %1125 = vmatprep.subr.bf16.mxu1 %v1662_v63  ;;  %v1757_v62 = vld [vmem:[%s2095_s5 + $0x3cc] ss:$16 sps:$4 sm:$0xff]   ;;  %v1752_v63 = vld [vmem:[%s2095_s5 + $0x3c0] ss:$16 sps:$4 sm:$0xff]  }
  0x98   : > { %1044 = vmatpush1.bf16.msra.mxu0 %v1664_v0  ;;  %1126 = vmatpush1.bf16.msra.mxu1 %v1665_v1  ;;  %v1755_v0 = vld [vmem:[%s2095_s5 + $0x3c8] ss:$16 sps:$4 sm:$0xff]   ;;  %v1760_v1 = vld [vmem:[%s2095_s5 + $0x3e4] ss:$16 sps:$4 sm:$0xff]  }
  0x99   : > { %1054 = vmatprep.subr.bf16.mxu0 %v1670_v2  ;;  %1136 = vmatprep.subr.bf16.mxu1 %v1673_v3  ;;  %v1763_v2 = vld [vmem:[%s2095_s5 + $0x3ec] ss:$16 sps:$4 sm:$0xff]   ;;  %v1758_v3 = vld [vmem:[%s2095_s5 + $0x3e0] ss:$16 sps:$4 sm:$0xff]  }
  0x9b   : > { %1046 = vmatmul.mubr.bf16.vlgmr.msra.gmra.mrb[0].mxu0 %v1343_v4  ;;  %1128 = vmatmul.mubr.bf16.vlgmr.msra.gmra.mrb[0].mxu1 %v1343_v4  ;;  %v1761_v4 = vld [vmem:[%s2095_s5 + $0x3e8] ss:$16 sps:$4 sm:$0xff]  }
  0x9c   : > { %1055 = vmatpush1.bf16.msra.mxu0 %v1668_v5  ;;  %1137 = vmatpush1.bf16.msra.mxu1 %v1671_v6  ;;  %v1345_v5 = vcombine.low %v2191_v29, %v2191_v29 }
  0x9d   : > { %1056 = vmatprep.subr.bf16.mxu0 %v1676_v7  ;;  %1138 = vmatprep.subr.bf16.mxu1 %v1679_v8 }
  0x9e   : > { %1086 = vmatprep.mubr.bf16.mxu0 %v1346_v30  ;;  %1168 = vmatprep.mubr.bf16.mxu1 %v1346_v30 }
  0xa0   : > { %1057 = vmatpush1.bf16.msra.mxu0 %v1674_v9  ;;  %1139 = vmatpush1.bf16.msra.mxu1 %v1677_v10 }
  0xa1   : > { %1058 = vmatprep.subr.bf16.mxu0 %v1682_v11  ;;  %1140 = vmatprep.subr.bf16.mxu1 %v1685_v12 }
  0xa4   : > { %1059 = vmatpush1.bf16.msra.mxu0 %v1680_v13  ;;  %1141 = vmatpush1.bf16.msra.mxu1 %v1683_v14 }
  0xa5   : > { %1060 = vmatprep.subr.bf16.mxu0 %v1688_v15  ;;  %1142 = vmatprep.subr.bf16.mxu1 %v1691_v16 }
  0xa8   : > { %1061 = vmatpush1.bf16.msra.mxu0 %v1686_v17  ;;  %1143 = vmatpush1.bf16.msra.mxu1 %v1689_v18 }
  0xa9   : > { %1062 = vmatprep.subr.bf16.mxu0 %v1694_v19  ;;  %1144 = vmatprep.subr.bf16.mxu1 %v1697_v20 }
  0xac   : > { %1063 = vmatpush1.bf16.msra.mxu0 %v1692_v21  ;;  %1145 = vmatpush1.bf16.msra.mxu1 %v1695_v22 }
  0xad   : > { %1064 = vmatprep.subr.bf16.mxu0 %v1700_v23  ;;  %1146 = vmatprep.subr.bf16.mxu1 %v1703_v24 }
  0xb0   : > { %1065 = vmatpush1.bf16.msra.mxu0 %v1698_v25  ;;  %1147 = vmatpush1.bf16.msra.mxu1 %v1701_v26 }
  0xb1   : > { %1066 = vmatprep.subr.bf16.mxu0 %v1706_v27  ;;  %1148 = vmatprep.subr.bf16.mxu1 %v1709_v28 }
  0xb4   : > { %1067 = vmatpush1.bf16.msra.mxu0 %v1704_v31  ;;  %1149 = vmatpush1.bf16.msra.mxu1 %v1707_v32 }
  0xb5   : > { %1068 = vmatprep.subr.bf16.mxu0 %v1712_v33  ;;  %1150 = vmatprep.subr.bf16.mxu1 %v1715_v34 }
  0xb8   : > { %1069 = vmatpush1.bf16.msra.mxu0 %v1710_v35  ;;  %1151 = vmatpush1.bf16.msra.mxu1 %v1713_v36 }
  0xb9   : > { %1070 = vmatprep.subr.bf16.mxu0 %v1718_v37  ;;  %1152 = vmatprep.subr.bf16.mxu1 %v1721_v38 }
  0xbc   : > { %1071 = vmatpush1.bf16.msra.mxu0 %v1716_v39  ;;  %1153 = vmatpush1.bf16.msra.mxu1 %v1719_v40 }
  0xbd   : > { %1072 = vmatprep.subr.bf16.mxu0 %v1724_v41  ;;  %1154 = vmatprep.subr.bf16.mxu1 %v1727_v42 }
  0xc0   : > { %1073 = vmatpush1.bf16.msra.mxu0 %v1722_v43  ;;  %1155 = vmatpush1.bf16.msra.mxu1 %v1725_v44 }
  0xc1   : > { %1074 = vmatprep.subr.bf16.mxu0 %v1730_v45  ;;  %1156 = vmatprep.subr.bf16.mxu1 %v1733_v46 }
  0xc4   : > { %1075 = vmatpush1.bf16.msra.mxu0 %v1728_v47  ;;  %1157 = vmatpush1.bf16.msra.mxu1 %v1731_v48 }
  0xc5   : > { %1076 = vmatprep.subr.bf16.mxu0 %v1736_v49  ;;  %1158 = vmatprep.subr.bf16.mxu1 %v1739_v50 }
  0xc8   : > { %1077 = vmatpush1.bf16.msra.mxu0 %v1734_v51  ;;  %1159 = vmatpush1.bf16.msra.mxu1 %v1737_v52 }
  0xc9   : > { %1078 = vmatprep.subr.bf16.mxu0 %v1742_v53  ;;  %1160 = vmatprep.subr.bf16.mxu1 %v1745_v54 }
  0xcc   : > { %1079 = vmatpush1.bf16.msra.mxu0 %v1740_v55  ;;  %1161 = vmatpush1.bf16.msra.mxu1 %v1743_v56 }
  0xcd   : > { %1080 = vmatprep.subr.bf16.mxu0 %v1748_v57  ;;  %1162 = vmatprep.subr.bf16.mxu1 %v1751_v58 }
  0xd0   : > { %1081 = vmatpush1.bf16.msra.mxu0 %v1746_v59  ;;  %1163 = vmatpush1.bf16.msra.mxu1 %v1749_v60 }
  0xd1   : > { %1082 = vmatprep.subr.bf16.mxu0 %v1754_v61  ;;  %1164 = vmatprep.subr.bf16.mxu1 %v1757_v62 }
  0xd4   : > { %1083 = vmatpush1.bf16.msra.mxu0 %v1752_v63  ;;  %1165 = vmatpush1.bf16.msra.mxu1 %v1755_v0 }
  0xd5   : > { %1084 = vmatprep.subr.bf16.mxu0 %v1760_v1  ;;  %1166 = vmatprep.subr.bf16.mxu1 %v1763_v2 }
  0xd8   : > { %1085 = vmatpush1.bf16.msra.mxu0 %v1758_v3  ;;  %1167 = vmatpush1.bf16.msra.mxu1 %v1761_v4 }
  0xdb   : > { %1087 = vmatmul.mubr.bf16.vlgmr.msra.gmra.mrb[0].mxu0 %v1345_v5  ;;  %1169 = vmatmul.mubr.bf16.vlgmr.msra.gmra.mrb[0].mxu1 %v1345_v5 }
 0x1ae   : > { %v1088_v6 = vpop.f32.mrb[0].mxu0  ;;  %v1170_v7 = vpop.f32.mrb[0].mxu1 }
 0x1af   : > { %v1090_v8 = vpop.f32.mrb[1].mxu0  ;;  %v1172_v9 = vpop.f32.mrb[1].mxu1 }
 0x1b0   : > { %v1483_v10 = vpack.c.bf16 %v1090_v8, %v1088_v6  ;;  %v1484_v11 = vpack.c.bf16 %v1172_v9, %v1170_v7  ;;  %v1092_v12 = vpop.f32.mrb[2].mxu0  ;;  %v1174_v13 = vpop.f32.mrb[2].mxu1 }
 0x1b1   : > { %v1093_v14 = vpop.f32.mrb[3].mxu0  ;;  %v1175_v15 = vpop.f32.mrb[3].mxu1 }
 0x1b2   : > { %1208 = vst [vmem:[%s212_s23] sm:$0xff] %v1483_v10  ;;  %1209 = vst [vmem:[%s212_s23 + $0x8] sm:$0xff] %v1484_v11 }
 0x1b3   : > { %1837 = shalt.err (!%p1834_p7)
}
 0x1b4   : > { %s1838_s8 = scalar_lea.hbm %s2240_s29, 256  ;;  %s1842_s24 = scalar_lea.hbm %s2291_s2, 512 }
 0x1b5   : > { %p1839_p13 = scmp.ne.s32.totalorder %s2240_s29, %s1838_s8  ;;  %p1843_p12 = scmp.lt.u32.totalorder %s2240_s29, %s2291_s2 }
 0x1b6   : > { %p1844_p4 = scmp.lt.u32.totalorder %s1842_s24, %s1838_s8  ;;  %p1846_p5 = scmp.lt.u32.totalorder %s1838_s8, %s2240_s29 }
 0x1b7   : > { %p1840_p2 = pnand %p1839_p13, %p2312_p10 }
 0x1b8   : > { %p1845_p8 = por %p1844_p4, %p1843_p12 }
 0x1b9   : > { %p1841_p6 = pneg %p1840_p2 }
 0x1ba   : > { %p1847_p11 = por %p1846_p5, %p1845_p8 }
 0x1bc   : > { %p1848_p1 = pnand %p1847_p11, %p1841_p6 }
 0x1be   : > { %1851 = shalt.err (!%p1848_p1)
}
 0x1bf   : > { %1500 = dma.vmem_to_hbm [thread:$0]  (%p2312_p10), %s2242_s26, 256, %s2240_s29, %s1211_s12  }
 0x1c0 PF: > { %s1239_s5 = sand.u32 1, %s1890_s9   ;;  %p2313_p0 = scmp.ne.s32.totalorder %s2302_s22, 0 }
 0x1c1   : > { %p2314_p9 = scmp.ge.s32.totalorder %s1910_s14, 2  ;;  %s1240_s18 = scalar_lea.sflag [#allocation5], %s1239_s5 }
 0x1c3   : > { %p1511_p3 = pnand %p2314_p9, %p2313_p0 }
 0x1c5   : > { %1885 = dma.done.wait (!%p1511_p3), %s1240_s18, 256  }
 0x1c6   : > { %1887 = vsyncadd (!%p1511_p3), %s1240_s18, 4294967040  ;;  %s19_s14 = sadd.s32 1, %s1910_s14   ;;  %s2315_s9 = smov %s1894_s10 }
 0x1c7   : > { %p16_p7 = scmp.ge.s32.totalorder %s19_s14, 4   ;;  %s2316_s10 = smov %s1898_s11 }
 0x1c8   : > { %s2317_s11 = smov %s2052_s25  ;;  %s2318_s12 = smov %s1906_s13 }
 0x1c9   : > { %s2319_s13 = smov %s2321_s28  ;;  %18 = sbr.rel (!%p16_p7) target bundleno = 7 (0x7), region = 87 }
 0x1d0   :  { %1245 = vsyncpa [#allocation4], 1 }
 0x1d1   :  { %1247 = vsyncpa [#allocation4 + $0x1], 1 }
 0x1d2   :  { %1248 = vsyncpa [#allocation7], 1 }
 0x1d3   :  { %1250 = vsyncpa [#allocation7 + $0x1], 1 }
 0x1d4   :  { %1251 = vsyncpa [#allocation5], 1 }
 0x1d5   :  { %1253 = vsyncpa [#allocation5 + $0x1], 1 }

</bundles_post_ra>
